<compile_context>
chip_gen: v5e
topology: v5e:2x2
jax: 0.10.0
libtpu: 0.0.40
codegen_flags: <defaults>
</compile_context>

<pallas_src>
import functools

import jax
import jax.numpy as jnp
from jax.experimental import pallas as pl
from jax.experimental.pallas import tpu as pltpu


# ------------------------------- math ----------------------------------------


def _dxdt(x, force, n):
    # pltpu.roll follows jnp.roll's shift convention (previously validated).
    x_m1 = pltpu.roll(x, shift=1, axis=1)             # x_{i-1}
    x_m2 = pltpu.roll(x, shift=2, axis=1)             # x_{i-2} (direct roll)
    x_p1 = pltpu.roll(x, shift=(n - 1) % n, axis=1)   # x_{i+1}
    return (x_p1 - x_m2) * x_m1 - x + force


def _rk4_step(x, force, dt, n):
    half_dt = 0.5 * dt
    k1 = _dxdt(x, force, n)
    k2 = _dxdt(x + half_dt * k1, force, n)
    k3 = _dxdt(x + half_dt * k2, force, n)
    k4 = _dxdt(x + dt * k3, force, n)
    # (k1 + k4) + 2*(k2 + k3): same math, one fewer multiply, shorter live set.
    return x + (dt / 6.0) * ((k1 + k4) + 2.0 * (k2 + k3))


# ------------------------------- kernel ---------------------------------------


def lorenz96_rk4_kernel(x_ref, o_ref, *, force, dt, n, num_steps, chunk,
                        n_chunks):
    def integrate(x):
        if num_steps == 1:
            return _rk4_step(x, force, dt, n)
        # Fused multi-step integration: state stays in vregs across steps.
        return jax.lax.fori_loop(
            0, num_steps, lambda _, xc: _rk4_step(xc, force, dt, n), x)

    if n_chunks == 1:
        o_ref[...] = integrate(x_ref[...])
    else:
        # Row-chunked loop: keeps the ~8 live RK4 temporaries vreg-resident
        # instead of spilling whole-tile intermediates through VMEM.
        @pl.loop(0, n_chunks)
        def _(c):
            r = pl.multiple_of(c * chunk, chunk)
            o_ref[pl.ds(r, chunk), :] = integrate(x_ref[pl.ds(r, chunk), :])


# ------------------------------- sizing ---------------------------------------


def _round_up(a, b):
    return ((a + b - 1) // b) * b


def _largest_div_mult8(total, cap):
    """Largest d with d % 8 == 0, d | total, d <= cap. `total` is a mult of 8."""
    cap = max(8, min(cap, total))
    best = 8
    for d in range(8, cap + 1, 8):
        if total % d == 0:
            best = d
    return best


def _pick_block_rows(b_pad, n, max_block_rows):
    """Rows per block: divisor of b_pad (no over-padding), >=2 blocks if B>=16."""
    # Per-block VMEM is just the 2x(in)+2x(out) pipeline buffers (chunked body
    # keeps RK4 temporaries in vregs): 4 * tb * n * 4 bytes <= ~24 MiB budget.
    vmem_budget_bytes = 24 << 20
    cap_vmem = max(8, vmem_budget_bytes // (4 * n * 4))
    # Guarantee >= 2 blocks when the batch allows it so v7x's two TensorCores
    # split the grid and the auto-pipeliner has something to double-buffer.
    cap_split = b_pad // 2 if b_pad >= 16 else b_pad
    cap = max(8, min(max_block_rows, cap_vmem, cap_split))
    return _largest_div_mult8(b_pad, cap)


def _pick_chunk_rows(tb, n):
    """Rows per in-kernel chunk: ~4 f32 vregs per RK4 temporary, divides tb."""
    target = max(8, ((4096 // n) // 8) * 8)
    return _largest_div_mult8(tb, min(target, tb))


# ------------------------------- wrapper --------------------------------------


def _lorenz96_pallas(x_flat, dt, force, num_steps, max_block_rows):
    """x_flat: (B, N) float32 -> one (or num_steps) RK4 step(s)."""
    B, N = x_flat.shape
    b_pad = _round_up(B, 8)
    if b_pad != B:
        # Only the sublane remainder (<= 7 rows) is padded; tb divides b_pad so
        # no tile-sized over-padding / extra HBM pass is introduced.
        x_in = jnp.pad(x_flat, ((0, b_pad - B), (0, 0)))
    else:
        x_in = x_flat

    tb = _pick_block_rows(b_pad, N, max_block_rows)
    chunk = _pick_chunk_rows(tb, N)
    n_chunks = tb // chunk

    # Explicit scoped-VMEM limit from the live-set estimate (pipeline buffers +
    # chunk temporaries), clamped so a v6e-sized choice never blows v7x's 64 MiB.
    pipeline_bytes = 4 * tb * N * 4          # 2x in + 2x out double buffers
    scratch_bytes = 16 * chunk * N * 4       # RK4 chunk temporaries (upper bound)
    vmem_limit = int(min(48 << 20,
                         max(32 << 20, 2 * (pipeline_bytes + scratch_bytes))))

    kernel = functools.partial(
        lorenz96_rk4_kernel,
        force=float(force),
        dt=float(dt),
        n=N,
        num_steps=int(num_steps),
        chunk=chunk,
        n_chunks=n_chunks,
    )
    out = pl.pallas_call(
        kernel,
        out_shape=jax.ShapeDtypeStruct((b_pad, N), jnp.float32),
        grid=(b_pad // tb,),
        in_specs=[pl.BlockSpec((tb, N), lambda i: (i, 0))],
        out_specs=pl.BlockSpec((tb, N), lambda i: (i, 0)),
        compiler_params=pltpu.CompilerParams(
            dimension_semantics=("parallel",),   # megacore sharding on v7x
            vmem_limit_bytes=vmem_limit,
        ),
    )(x_in)
    if b_pad != B:
        out = out[:B]
    return out


def lorenz96_forward(x0, t, dt, force, *, num_steps=1, max_block_rows=1024):
    """Mirrors Lorenz96_torch.forward (1-D -> (1,N), 2-D -> (B,N), 3-D kept)."""
    del t  # autonomous system; torch passes t = nan into rk4
    x = jnp.asarray(x0, dtype=jnp.float32)
    if x.ndim == 1:
        x = x[None, None, :]      # (1, 1, N)
    elif x.ndim == 2:
        x = x[:, None, :]         # (B, 1, N)
    assert x.ndim == 3
    B, C, N = x.shape
    if N % 128 != 0:
        # TODO(synk): classic Lorenz-96 N=40 (or any N % 128 != 0) needs the
        # sublane-N / lane-batch layout so rolls stay exact and stores are
        # lane-dense; gated here rather than risking lane-roll-over-padding.
        raise NotImplementedError("Pallas Lorenz-96 kernel requires N % 128 == 0")

    out = _lorenz96_pallas(x.reshape(B * C, N), dt, force, num_steps,
                           max_block_rows)
    out = out.reshape(B, C, N)
    # torch.squeeze(dim=1): drops the channel dim only if it is size 1.
    if C == 1:
        out = out[:, 0, :]
    return out


# ---------------- pure-JAX reference (correctness check only) ----------------


def _dxdt_ref(x, force):
    return (
        jnp.roll(x, -1, axis=-1) - jnp.roll(x, 2, axis=-1)
    ) * jnp.roll(x, 1, axis=-1) - x + force


def lorenz96_forward_ref(x0, dt, force):
    k1 = _dxdt_ref(x0, force)
    k2 = _dxdt_ref(x0 + 0.5 * dt * k1, force)
    k3 = _dxdt_ref(x0 + 0.5 * dt * k2, force)
    k4 = _dxdt_ref(x0 + dt * k3, force)
    return x0 + dt / 6.0 * (k1 + 2.0 * k2 + 2.0 * k3 + k4)


# ----------------------------------- demo ------------------------------------

if __name__ == "__main__":
    # Module has no learned parameters; `force` is the only (scalar) parameter.
    force = 8.0
    dt = 0.01

    # --- single RK4 step (matches torch forward); B=16 -> grid=(2,) blocks ---
    B, N = 16, 128
    x0 = jax.random.normal(jax.random.PRNGKey(0), (B, N), dtype=jnp.float32)
    out = jax.block_until_ready(lorenz96_forward(x0, None, dt, force))
    ref = lorenz96_forward_ref(x0, dt, force)
    assert out.shape == (B, N) and out.dtype == jnp.float32
    assert jnp.allclose(out, ref, atol=1e-5, rtol=1e-5), "single-step mismatch"

    # --- multi-vreg lane rolls: N = 256 (roll across vreg boundaries) --------
    x256 = jax.random.normal(jax.random.PRNGKey(2), (8, 256), dtype=jnp.float32)
    out256 = jax.block_until_ready(lorenz96_forward(x256, None, dt, force))
    assert jnp.allclose(out256, lorenz96_forward_ref(x256, dt, force),
                        atol=1e-5, rtol=1e-5), "N=256 mismatch"

    # --- fused multi-step integration (state resident in vregs/VMEM) ---------
    steps = 4
    out_multi = jax.block_until_ready(
        lorenz96_forward(x0, None, dt, force, num_steps=steps))
    ref_multi = x0
    for _ in range(steps):
        ref_multi = lorenz96_forward_ref(ref_multi, dt, force)
    assert jnp.allclose(out_multi, ref_multi, atol=1e-4, rtol=1e-4), \
        "multi-step mismatch"

    # --- 1-D input path (torch returns shape (1, N) here) --------------------
    x1 = jax.random.normal(jax.random.PRNGKey(1), (128,), dtype=jnp.float32)
    out1 = jax.block_until_ready(lorenz96_forward(x1, None, dt, force))
    assert out1.shape == (1, 128)
    assert jnp.allclose(out1[0], lorenz96_forward_ref(x1, dt, force),
                        atol=1e-5, rtol=1e-5), "1-D path mismatch"

    # --- 3-D input with C > 1 keeps the channel dim (squeeze(dim=1) no-op) ---
    x3 = jax.random.normal(jax.random.PRNGKey(3), (2, 3, 128), dtype=jnp.float32)
    out3 = jax.block_until_ready(lorenz96_forward(x3, None, dt, force))
    assert out3.shape == (2, 3, 128)
    assert jnp.allclose(out3, lorenz96_forward_ref(x3, dt, force),
                        atol=1e-5, rtol=1e-5), "3-D path mismatch"

    print("KERNEL_OK")
</pallas_src>

<mosaic_0001>
module attributes {stable_mosaic.version = 11 : i64} {
  func.func @lorenz96_rk4_kernel(%arg0: i32, %arg1: memref<8x128xf32, #tpu.memory_space<vmem>>, %arg2: memref<8x128xf32, #tpu.memory_space<vmem>>) attributes {dimension_semantics = [#tpu.dimension_semantics<parallel>], iteration_bounds = array<i64: 2>, scalar_prefetch = 0 : i64, scratch_operands = 0 : i64, tpu.core_type = #tpu.core_type<tc>, window_params = [{transform_indices = @transform_0, window_bounds = array<i64: 8, 128>}, {transform_indices = @transform_1, window_bounds = array<i64: 8, 128>}]} {
    %c0 = arith.constant 0 : index
    %c0_0 = arith.constant 0 : index
    %0 = vector.load %arg1[%c0, %c0_0] : memref<8x128xf32, #tpu.memory_space<vmem>>, vector<8x128xf32>
    %c1_i32 = arith.constant 1 : i32
    %1 = tpu.dynamic_rotate %0 by %c1_i32 dim 1 : vector<8x128xf32>, i32 -> vector<8x128xf32>
    %c2_i32 = arith.constant 2 : i32
    %2 = tpu.dynamic_rotate %0 by %c2_i32 dim 1 : vector<8x128xf32>, i32 -> vector<8x128xf32>
    %c127_i32 = arith.constant 127 : i32
    %3 = tpu.dynamic_rotate %0 by %c127_i32 dim 1 : vector<8x128xf32>, i32 -> vector<8x128xf32>
    %4 = arith.subf %3, %2 : vector<8x128xf32>
    %5 = arith.mulf %4, %1 : vector<8x128xf32>
    %6 = arith.subf %5, %0 : vector<8x128xf32>
    %cst = arith.constant 8.000000e+00 : f32
    %7 = vector.broadcast %cst : f32 to vector<8x128xf32>
    %8 = arith.addf %6, %7 : vector<8x128xf32>
    %cst_1 = arith.constant 5.000000e-03 : f32
    %9 = vector.broadcast %cst_1 : f32 to vector<8x128xf32>
    %10 = arith.mulf %9, %8 : vector<8x128xf32>
    %11 = arith.addf %0, %10 : vector<8x128xf32>
    %c1_i32_2 = arith.constant 1 : i32
    %12 = tpu.dynamic_rotate %11 by %c1_i32_2 dim 1 : vector<8x128xf32>, i32 -> vector<8x128xf32>
    %c2_i32_3 = arith.constant 2 : i32
    %13 = tpu.dynamic_rotate %11 by %c2_i32_3 dim 1 : vector<8x128xf32>, i32 -> vector<8x128xf32>
    %c127_i32_4 = arith.constant 127 : i32
    %14 = tpu.dynamic_rotate %11 by %c127_i32_4 dim 1 : vector<8x128xf32>, i32 -> vector<8x128xf32>
    %15 = arith.subf %14, %13 : vector<8x128xf32>
    %16 = arith.mulf %15, %12 : vector<8x128xf32>
    %17 = arith.subf %16, %11 : vector<8x128xf32>
    %cst_5 = arith.constant 8.000000e+00 : f32
    %18 = vector.broadcast %cst_5 : f32 to vector<8x128xf32>
    %19 = arith.addf %17, %18 : vector<8x128xf32>
    %cst_6 = arith.constant 5.000000e-03 : f32
    %20 = vector.broadcast %cst_6 : f32 to vector<8x128xf32>
    %21 = arith.mulf %20, %19 : vector<8x128xf32>
    %22 = arith.addf %0, %21 : vector<8x128xf32>
    %c1_i32_7 = arith.constant 1 : i32
    %23 = tpu.dynamic_rotate %22 by %c1_i32_7 dim 1 : vector<8x128xf32>, i32 -> vector<8x128xf32>
    %c2_i32_8 = arith.constant 2 : i32
    %24 = tpu.dynamic_rotate %22 by %c2_i32_8 dim 1 : vector<8x128xf32>, i32 -> vector<8x128xf32>
    %c127_i32_9 = arith.constant 127 : i32
    %25 = tpu.dynamic_rotate %22 by %c127_i32_9 dim 1 : vector<8x128xf32>, i32 -> vector<8x128xf32>
    %26 = arith.subf %25, %24 : vector<8x128xf32>
    %27 = arith.mulf %26, %23 : vector<8x128xf32>
    %28 = arith.subf %27, %22 : vector<8x128xf32>
    %cst_10 = arith.constant 8.000000e+00 : f32
    %29 = vector.broadcast %cst_10 : f32 to vector<8x128xf32>
    %30 = arith.addf %28, %29 : vector<8x128xf32>
    %cst_11 = arith.constant 0.00999999977 : f32
    %31 = vector.broadcast %cst_11 : f32 to vector<8x128xf32>
    %32 = arith.mulf %31, %30 : vector<8x128xf32>
    %33 = arith.addf %0, %32 : vector<8x128xf32>
    %c1_i32_12 = arith.constant 1 : i32
    %34 = tpu.dynamic_rotate %33 by %c1_i32_12 dim 1 : vector<8x128xf32>, i32 -> vector<8x128xf32>
    %c2_i32_13 = arith.constant 2 : i32
    %35 = tpu.dynamic_rotate %33 by %c2_i32_13 dim 1 : vector<8x128xf32>, i32 -> vector<8x128xf32>
    %c127_i32_14 = arith.constant 127 : i32
    %36 = tpu.dynamic_rotate %33 by %c127_i32_14 dim 1 : vector<8x128xf32>, i32 -> vector<8x128xf32>
    %37 = arith.subf %36, %35 : vector<8x128xf32>
    %38 = arith.mulf %37, %34 : vector<8x128xf32>
    %39 = arith.subf %38, %33 : vector<8x128xf32>
    %cst_15 = arith.constant 8.000000e+00 : f32
    %40 = vector.broadcast %cst_15 : f32 to vector<8x128xf32>
    %41 = arith.addf %39, %40 : vector<8x128xf32>
    %42 = arith.addf %8, %41 : vector<8x128xf32>
    %43 = arith.addf %19, %30 : vector<8x128xf32>
    %cst_16 = arith.constant 2.000000e+00 : f32
    %44 = vector.broadcast %cst_16 : f32 to vector<8x128xf32>
    %45 = arith.mulf %44, %43 : vector<8x128xf32>
    %46 = arith.addf %42, %45 : vector<8x128xf32>
    %cst_17 = arith.constant 0.00166666671 : f32
    %47 = vector.broadcast %cst_17 : f32 to vector<8x128xf32>
    %48 = arith.mulf %47, %46 : vector<8x128xf32>
    %49 = arith.addf %0, %48 : vector<8x128xf32>
    %c0_18 = arith.constant 0 : index
    %c0_19 = arith.constant 0 : index
    %50 = vector.load %arg2[%c0_18, %c0_19] : memref<8x128xf32, #tpu.memory_space<vmem>>, vector<8x128xf32>
    tpu.vector_store %arg2[%c0_18, %c0_19], %49 {strides = array<i32>} : memref<8x128xf32, #tpu.memory_space<vmem>>, vector<8x128xf32>,
    return
  }
  func.func @transform_0(%arg0: i32) -> (i32, i32) {
    %c0_i32 = arith.constant 0 : i32
    %c0_i32_0 = arith.constant 0 : i32
    return %arg0, %c0_i32 : i32, i32
  }
  func.func @transform_1(%arg0: i32) -> (i32, i32) {
    %c0_i32 = arith.constant 0 : i32
    %c0_i32_0 = arith.constant 0 : i32
    return %arg0, %c0_i32 : i32, i32
  }
}

</mosaic_0001>

<bundles_post_ra>
// kernel: tpu_custom_call.1
= control target key start
LH: loop header
LB: loop body
LE: loop exit
PB: predicated region body
PF: predicated region fallthrough
CT: control target
= control target key end

     0   :  { %6 = vsyncpa [#allocation3], 0  ;;  %s589_s0 = inlined_call_operand.hbm [shape: f32[16,128], index: 0, kind: input, shape index: {}]   ;;  %s590_s1 = inlined_call_operand.hbm [shape: f32[16,128], index: 1, kind: output, shape index: {}]  }
   0x1   :  { %8 = vsyncpa [#allocation3 + $0x1], 0 }
   0x2   :  { %9 = vsyncpa [#allocation4], 0 }
   0x3   :  { %11 = vsyncpa [#allocation4 + $0x1], 0  ;;  %s446_s6 = smov 0   ;;  %s448_s7 = smov 0  }
   0x4   :  { %s450_s8 = smov 0   ;;  %s452_s9 = smov 0  }
   0x5 LB: > { %s467_s10 = sadd.s32 4294967295, %s431_s9   ;;  %s274_s11 = sadd.s32 4294967294, %s431_s9   ;;  %s431_s9 = sphi %s452_s9, %s600_s9   ;;  %s427_s8 = sphi %s450_s8, %s599_s8   ;;  %s423_s7 = sphi %s448_s7, %s598_s7   ;;  %s419_s6 = sphi %s446_s6, %s597_s6  }
   0x6   : > { %s471_s12 = sadd.s32 1, %s431_s9   ;;  %s24_s13 = sadd.s32 1, %s427_s8 }
   0x7   : > { %s21_s14 = ssub.s32 %s431_s9, %s471_s12  ;;  %p31_p0 = scmp.ne.s32.totalorder %s427_s8, %s423_s7 }
   0x8   : > { %p22_p1 = scmp.eq.s32.totalorder %s21_s14, 0  ;;  %p32_p2 = scmp.eq.s32.totalorder %s431_s9, 0 }
   0x9   : > { %p37_p3 = scmp.ne.s32.totalorder %s423_s7, %s419_s6  ;;  %p38_p4 = scmp.eq.s32.totalorder %s467_s10, 0 }
   0xa   : > { %s483_s15 = scalar_select %p22_p1, %s427_s8, %s24_s13  }
   0xb   : > { %p485_p5 = por %p32_p2, %p31_p0  ;;  %p489_p6 = por %p38_p4, %p37_p3 }
   0xc   : > { %p61_p7 = scmp.eq.s32.totalorder %s467_s10, 1  ;;  %p67_p8 = scmp.eq.s32.totalorder %s274_s11, 1 }
   0xd   : > { %p298_p10 = scmp.lt.s32.totalorder %s431_s9, 2  ;;  %s87_s20 = sand.u32 1, %s427_s8  }
   0xe   : > { %p496_p11 = por %p61_p7, %p31_p0  ;;  %p500_p12 = por %p67_p8, %p37_p3 }
   0xf   : > { %s278_s21 = sshll.u32 %s431_s9, 3  ;;  %s277_s22 = sshll.u32 %s87_s20, 3 }
  0x10   : > { %s95_s25 = scalar_lea.hbm %s589_s0, %s278_s21  ;;  %s91_s27 = scalar_lea.vmem [#allocation2], %s277_s22 }
  0x11   : > { %s97_s26 = sshll.u32 %s95_s25, 4  ;;  %s99_s28 = sshll.u32 %s91_s27, 4  ;;  %s98_s26 = int_to_ptr.hbm [resolvable:$true] %s97_s26  ;;  %s100_s28 = int_to_ptr.vmem [resolvable:$true] %s99_s28 }
  0x12   : > { %p511_p13 = pnand %p298_p10, %p485_p5  ;;  %p279_p0 = scmp.ge.s32.totalorder %s431_s9, 1 }
  0x13   : > { %p104_p1 = scmp.lt.s32.totalorder %s431_s9, 3  ;;  %s88_s30 = scalar_lea.sflag [#allocation3], %s87_s20 }
  0x14   : > { %s335_s2 = sshra.s32 %s98_s26, 4  ;;  %p339_p3 = pneg %p511_p13  ;;  %s336_s2 = int_to_ptr.hbm [resolvable:$true] %s335_s2 }
  0x15   : > { %s337_s3 = scalar_lea.hbm %s336_s2, 8  ;;  %s342_s11 = scalar_lea.hbm %s589_s0, 16 }
  0x16   : > { %p338_p2 = scmp.ne.s32.totalorder %s336_s2, %s337_s3  ;;  %p343_p5 = scmp.lt.s32.totalorder %s336_s2, %s589_s0 }
  0x17   : > { %p344_p8 = scmp.lt.s32.totalorder %s342_s11, %s337_s3 }
  0x18   : > { %p340_p4 = pnand %p339_p3, %p338_p2 }
  0x19   : > { %p345_p10 = por %p344_p8, %p343_p5 }
  0x1a   : > { %p341_p7 = pneg %p340_p4 }
  0x1c   : > { %p346_p9 = pnand %p345_p10, %p341_p7 }
  0x1e   : > { %349 = shalt.err (!%p346_p9)
}
  0x1f   : > { %293 = dma.hbm_to_vmem [thread:$0]  (!%p511_p13), %s98_s26, 128, %s100_s28, %s88_s30  }
  0x20   : > { %p105_p2 = pnand %p279_p0, %p104_p1 }
  0x21   : > { %s532_s16 = sand.u32 (!%p105_p2), 1, %s423_s7  }
  0x22   : > { %108 = sbr.rel (%p105_p2) target bundleno = 566 (0x236), region = 24  ;;  %s280_s20 = sshll.u32 (!%p105_p2), %s532_s16, 3 }
  0x23   : > { %s111_s21 = scalar_lea.sflag (!%p105_p2), [#allocation3], %s532_s16  ;;  %s114_s22 = scalar_lea.vmem (!%p105_p2), [#allocation2], %s280_s20 }
  0x27   : > { %410 = dma.done.wait (%p489_p6), %s111_s21, 128  }
  0x28   : > { %412 = vsyncadd (%p489_p6), %s111_s21, 4294967168  ;;  %v134_v0 = vld [vmem:[%s114_s22] sm:$0xff]  ;;  %s433_s23 = smov 2   ;;  %s434_s24 = smov 1  }
  0x29   : > { %137 = vrot.lane.b32.xlu0 %v134_v0, %s433_s23  ;;  %135 = vrot.lane.b32.xlu1 %v134_v0, %s434_s24  ;;  %s435_s25 = smov 127   ;;  %s283_s17 = sshll.u32 %s467_s10, 3 }
  0x2a   : > { %s199_s28 = scalar_lea.hbm %s590_s1, %s283_s17  ;;  %s133_s29 = scalar_lea.vmem [#allocation5], %s280_s20 }
  0x2b   : > { %s201_s30 = sshll.u32 %s133_s29, 4  ;;  %s203_s2 = sshll.u32 %s199_s28, 4  ;;  %s202_s30 = int_to_ptr.vmem [resolvable:$true] %s201_s30  ;;  %s204_s2 = int_to_ptr.hbm [resolvable:$true] %s203_s2 }
  0x2c   : > { %s189_s3 = scalar_lea.sflag [#allocation4], %s532_s16  ;;  %s379_s10 = sshra.s32 %s204_s2, 4  ;;  %s380_s10 = int_to_ptr.hbm [resolvable:$true] %s379_s10 }
  0x2d   : > { %s381_s4 = scalar_lea.hbm %s380_s10, 8  ;;  %s385_s13 = scalar_lea.hbm %s590_s1, 16 }
  0x2e   : > { %p382_p6 = scmp.ne.s32.totalorder %s380_s10, %s381_s4  ;;  %p386_p0 = scmp.lt.s32.totalorder %s380_s10, %s590_s1 }
  0x2f   : > { %p387_p1 = scmp.lt.s32.totalorder %s385_s13, %s381_s4 }
  0x30   : > { %p383_p9 = pnand %p382_p6, %p496_p11 }
  0x31   : > { %139 = vrot.lane.b32.xlu0 %v134_v0, %s435_s25  ;;  %p388_p3 = por %p387_p1, %p386_p0 }
  0x32   : > { %p384_p13 = pneg %p383_p9 }
  0x34   : > { %p389_p4 = pnand %p388_p3, %p384_p13 }
  0x9b   : > { %v138_v1 = vpop.permute.xlu0 %137  ;;  %v136_v3 = vpop.permute.xlu1 %135 }
  0xa3   : > { %v140_v2 = vpop.permute.xlu0 %139 }
  0xa4   : > { %v141_v4 = vsub.f32 %v140_v2, %v138_v1 }
  0xa6   : > { %v142_v5 = vmul.f32 %v141_v4, %v136_v3 }
  0xa8   : > { %v143_v6 = vsub.f32 %v142_v5, %v134_v0 }
  0xaa   : > { %v144_v7 = vadd.f32 8.0, %v143_v6 }
  0xac   : > { %v145_v8 = vmul.f32 0.005, %v144_v7 }
  0xae   : > { %v146_v9 = vadd.f32 %v145_v8, %v134_v0 }
  0xb0   : > { %151 = vrot.lane.b32.xlu2 %v146_v9, %s435_s25  ;;  %149 = vrot.lane.b32.xlu1 %v146_v9, %s433_s23 }
  0xb8   : > { %147 = vrot.lane.b32.xlu2 %v146_v9, %s434_s24 }
 0x10a   : > { %v152_v10 = vpop.permute.xlu2 %151 }
 0x112   : > { %v148_v13 = vpop.permute.xlu2 %147 }
 0x122   : > { %v150_v11 = vpop.permute.xlu1 %149 }
 0x123   : > { %v153_v12 = vsub.f32 %v152_v10, %v150_v11 }
 0x125   : > { %v154_v14 = vmul.f32 %v153_v12, %v148_v13 }
 0x127   : > { %v155_v15 = vsub.f32 %v154_v14, %v146_v9 }
 0x129   : > { %v156_v16 = vadd.f32 8.0, %v155_v15 }
 0x12b   : > { %v157_v17 = vmul.f32 0.005, %v156_v16 }
 0x12d   : > { %v158_v18 = vadd.f32 %v157_v17, %v134_v0 }
 0x12f   : > { %159 = vrot.lane.b32.xlu2 %v158_v18, %s434_s24  ;;  %163 = vrot.lane.b32.xlu1 %v158_v18, %s435_s25 }
 0x130   : > { %161 = vrot.lane.b32.xlu0 %v158_v18, %s433_s23 }
 0x189   : > { %v160_v22 = vpop.permute.xlu2 %159 }
 0x1a1   : > { %v164_v19 = vpop.permute.xlu1 %163 }
 0x1a2   : > { %v162_v20 = vpop.permute.xlu0 %161 }
 0x1a3   : > { %v165_v21 = vsub.f32 %v164_v19, %v162_v20 }
 0x1a5   : > { %v166_v23 = vmul.f32 %v165_v21, %v160_v22 }
 0x1a7   : > { %v167_v24 = vsub.f32 %v166_v23, %v158_v18 }
 0x1a9   : > { %v168_v25 = vadd.f32 8.0, %v167_v24 }
 0x1ab   : > { %v169_v26 = vmul.f32 0.01, %v168_v25  ;;  %v182_v33 = vadd.f32 %v168_v25, %v156_v16 }
 0x1ad   : > { %v170_v27 = vadd.f32 %v169_v26, %v134_v0  ;;  %v183_v36 = vmul.f32 2.0, %v182_v33 }
 0x1af   : > { %171 = vrot.lane.b32.xlu2 %v170_v27, %s434_s24  ;;  %175 = vrot.lane.b32.xlu1 %v170_v27, %s435_s25 }
 0x1b0   : > { %173 = vrot.lane.b32.xlu0 %v170_v27, %s433_s23 }
 0x209   : > { %v172_v31 = vpop.permute.xlu2 %171 }
 0x221   : > { %v176_v28 = vpop.permute.xlu1 %175 }
 0x222   : > { %v174_v29 = vpop.permute.xlu0 %173 }
 0x223   : > { %v177_v30 = vsub.f32 %v176_v28, %v174_v29 }
 0x225   : > { %v178_v32 = vmul.f32 %v177_v30, %v172_v31 }
 0x227   : > { %v179_v34 = vsub.f32 %v178_v32, %v170_v27 }
 0x229   : > { %v180_v35 = vadd.f32 8.0, %v179_v34 }
 0x22b   : > { %v181_v37 = vadd.f32 %v180_v35, %v144_v7 }
 0x22d   : > { %v184_v38 = vadd.f32 %v183_v36, %v181_v37 }
 0x22f   : > { %v185_v39 = vmul.f32 0.0016666667, %v184_v38 }
 0x231   : > { %v186_v40 = vadd.f32 %v185_v39, %v134_v0 }
 0x233   : > { %187 = vst [vmem:[%s133_s29] sm:$0xff] %v186_v40 }
 0x234   : > { %392 = shalt.err (!%p389_p4)
}
 0x235   : > { %288 = dma.vmem_to_hbm [thread:$0]  (%p496_p11), %s202_s30, 128, %s204_s2, %s189_s3  }
 0x236 PF: > { %s215_s16 = sand.u32 1, %s419_s6   ;;  %p596_p7 = scmp.ge.s32.totalorder %s431_s9, 2 }
 0x237   : > { %s216_s21 = scalar_lea.sflag [#allocation4], %s215_s16 }
 0x238   : > { %p295_p5 = pnand %p596_p7, %p500_p12 }
 0x23a   : > { %p296_p8 = pneg %p295_p5 }
 0x23c   : > { %414 = dma.done.wait (%p296_p8), %s216_s21, 128  }
 0x23d   : > { %416 = vsyncadd (%p296_p8), %s216_s21, 4294967168  ;;  %p14_p10 = scmp.ge.s32.totalorder %s471_s12, 4   ;;  %s597_s6 = smov %s423_s7 }
 0x23e   : > { %s598_s7 = smov %s427_s8  ;;  %s599_s8 = smov %s483_s15 }
 0x23f   : > { %s600_s9 = smov %s471_s12  ;;  %16 = sbr.rel (!%p14_p10) target bundleno = 5 (0x5), region = 69 }
 0x244   :  { %222 = vsyncpa [#allocation3], 1 }
 0x245   :  { %224 = vsyncpa [#allocation3 + $0x1], 1 }
 0x246   :  { %225 = vsyncpa [#allocation4], 1 }
 0x247   :  { %227 = vsyncpa [#allocation4 + $0x1], 1 }

</bundles_post_ra>
